<compile_context>
chip_gen: v7x
topology: tpu7x:2x2x1
jax: 0.10.0
libtpu: 0.0.40
codegen_flags: <defaults>
</compile_context>

<pallas_src>
import functools

import numpy as np

import jax
import jax.numpy as jnp
from jax.experimental import pallas as pl
from jax.experimental.pallas import tpu as pltpu

LANE = 128           # lane width
SUBLANE = 8          # f32 sublane tile
TILE_ND = 256        # destination-node tile (split into 128-row sub-tiles in-kernel)
DST_SUB = 128        # live logit tile rows (keeps the e/t tiles under the 64-vreg file)
TILE_NS = 128        # source-node tile (lane axis / softmax reduction axis)
PROJ_TILE_N = 256    # projection row tile (amortizes resident weights / per-step overhead)
VMEM_LIMIT_BYTES = 32 * 1024 * 1024


def _round_up(x, m):
    return ((x + m - 1) // m) * m


def _use_bf16_exp():
    """bf16 EUP/VPU only exists on v6e/v7x; keep f32 math on v5e and older."""
    try:
        kind = jax.devices()[0].device_kind.lower()
    except Exception:
        return False
    return ("v6" in kind) or ("v7" in kind)


# --------------------------------------------------------------------------------------
# Projection kernel: out = x @ w + b for every (edge_type, {lin_l, lin_r}) pair.
# Node features are shared per node type via the scalar-prefetched xmap (g -> node type).
# Emits a bf16 lane-dense slab (xl) and a narrow f32 slab (xr / xlt source).
# --------------------------------------------------------------------------------------
def _proj_kernel(xmap_ref, x_ref, w_ref, b_ref, ob_ref, on_ref):
    del xmap_ref  # only used by the index_maps
    acc = jnp.dot(x_ref[...], w_ref[...],
                  preferred_element_type=jnp.float32) + b_ref[...]
    ob_ref[...] = acc.astype(jnp.bfloat16)          # [tile_n, C_pad] bf16 (MXU aggregation)
    on_ref[...] = acc[:, :on_ref.shape[-1]]         # [tile_n, C_act] f32 (attention logits)


def batched_linear(xmap, x_types, w_all, b_all, c_act, tile_n):
    """xmap [G] i32, x_types [T, NP, F_pad] bf16, w_all [G, F_pad, C_pad] bf16,
    b_all [G, 1, C_pad] f32.  Returns (bf16 [G, NP, C_pad], f32 [G, NP, c_act])."""
    _, NP, F_pad = x_types.shape
    G, _, C_pad = w_all.shape
    return pl.pallas_call(
        _proj_kernel,
        out_shape=(
            jax.ShapeDtypeStruct((G, NP, C_pad), jnp.bfloat16),
            jax.ShapeDtypeStruct((G, NP, c_act), jnp.float32),
        ),
        grid_spec=pltpu.PrefetchScalarGridSpec(
            num_scalar_prefetch=1,
            grid=(G, NP // tile_n),
            in_specs=[
                pl.BlockSpec((None, tile_n, F_pad), lambda g, i, xm: (xm[g], i, 0)),
                pl.BlockSpec((None, F_pad, C_pad), lambda g, i, xm: (g, 0, 0)),
                pl.BlockSpec((None, 1, C_pad), lambda g, i, xm: (g, 0, 0)),
            ],
            out_specs=(
                pl.BlockSpec((None, tile_n, C_pad), lambda g, i, xm: (g, i, 0)),
                pl.BlockSpec((None, tile_n, c_act), lambda g, i, xm: (g, i, 0)),
            ),
        ),
        compiler_params=pltpu.CompilerParams(
            dimension_semantics=("parallel", "parallel"),
            vmem_limit_bytes=VMEM_LIMIT_BYTES),
    )(xmap, x_types, w_all, b_all)


# --------------------------------------------------------------------------------------
# GATv2 attention kernel: all edge types, flash-style online softmax, CSR tile skip.
# --------------------------------------------------------------------------------------
def _gatv2_attn_kernel(tile_idx_ref, tile_cnt_ref,
                       adj_ref, xlt_ref, xr_ref, xl_ref, att_ref, bias_ref,
                       out_ref, m_sc, l_sc, acc_sc,
                       *, nd_tiles, s_max, n_sub, sub_rows, c_act, bf16_exp):
    del tile_idx_ref  # only used by the index_maps
    nd = pl.program_id(0)            # destination tile
    et = pl.program_id(1)            # edge type
    s = pl.program_id(2)             # position in this (et, nd)'s nonzero-source-tile list

    @pl.when(s == 0)
    def _init():
        m_sc[...] = jnp.full(m_sc.shape, -1e30, m_sc.dtype)
        l_sc[...] = jnp.zeros(l_sc.shape, l_sc.dtype)
        acc_sc[...] = jnp.zeros(acc_sc.shape, acc_sc.dtype)

    n_nonzero = tile_cnt_ref[et * nd_tiles + nd]

    @pl.when(s < n_nonzero)          # skip ragged-tail (padded) steps entirely
    def _accumulate():
        xlt = xlt_ref[...]           # [C_act, tns] f32: lin_l(x_src)^T, src nodes on lanes
        xl = xl_ref[...]             # [tns, C_pad] bf16: lin_l(x_src) for the MXU aggregation
        att_c = [att_ref[et, c] for c in range(c_act)]   # SMEM scalars, hoisted

        for sub in range(n_sub):     # 128-row dst sub-tiles sharing one adj/xl fetch
            rows = slice(sub * sub_rows, (sub + 1) * sub_rows)
            xr = xr_ref[rows, :]                             # [sub, C_act] f32 lin_r(x_dst)
            adj = adj_ref[rows, :].astype(jnp.float32)       # [sub, tns] edge-count mask

            # GATv2 logits e[i, j] = att . leaky_relu(xl[j] + xr[i], 0.2); src on lanes.
            logits = None
            for c in range(c_act):
                t = xr[:, c:c + 1] + xlt[c:c + 1, :]         # [sub, tns]
                t = jnp.maximum(t, 0.2 * t)                  # LeakyReLU(0.2), 1 VPU op
                term = att_c[c] * t
                logits = term if logits is None else logits + term
            logits = jnp.where(adj > 0, logits, jnp.float32(-1e30))

            # Online softmax across the streamed nonzero source tiles.
            m_prev = m_sc[rows, :]
            m_new = jnp.maximum(m_prev, jnp.max(logits, axis=-1, keepdims=True))
            corr = jnp.exp(m_prev - m_new)
            d = logits - m_new
            if bf16_exp:             # v6e/v7x: bf16 EUP doubles exp throughput
                p = jnp.exp(d.astype(jnp.bfloat16)).astype(jnp.float32)
            else:                    # v5e & older: no bf16 EUP/VPU — keep f32
                p = jnp.exp(d)
            p = p * adj              # counts => parallel edges weighted like PyG softmax
            l_sc[rows, :] = corr * l_sc[rows, :] + jnp.sum(p, axis=-1, keepdims=True)
            acc_sc[rows, :] = corr * acc_sc[rows, :] + jnp.dot(
                p.astype(jnp.bfloat16), xl, preferred_element_type=jnp.float32)
            m_sc[rows, :] = m_new

    @pl.when(s == s_max - 1)
    def _finalize():
        denom = l_sc[...]
        inv = pl.reciprocal(jnp.where(denom > 0, denom, 1.0), approx=False)
        msg = jnp.where(denom > 0, acc_sc[...] * inv, 0.0)   # dst with no in-edges -> 0
        out_ref[...] = msg + bias_ref[...]


def gatv2_hetero_attention(tile_idx, tile_cnt, adj_all, xlt_all, xr_all, xl_all,
                           att_all, bias_all, *, s_max, tnd, tns, bf16_exp, nnz_tiles):
    """tile_idx [E*ND*s_max] i32, tile_cnt [E*ND] i32, adj_all [E,NP,NP] bf16,
    xlt_all [E,C_act,NP] f32, xr_all [E,NP,C_act] f32, xl_all [E,NP,C_pad] bf16,
    att_all [E,C_act] f32 (SMEM), bias_all [E,1,C_pad] f32."""
    E, NP, _ = adj_all.shape
    C_act = xlt_all.shape[1]
    C_pad = xl_all.shape[-1]
    ND = NP // tnd
    sub_rows = min(DST_SUB, tnd)
    n_sub = tnd // sub_rows

    kernel = functools.partial(
        _gatv2_attn_kernel, nd_tiles=ND, s_max=s_max, n_sub=n_sub,
        sub_rows=sub_rows, c_act=C_act, bf16_exp=bf16_exp)

    def src_tile(nd, e, s, ti, tc):
        return ti[(e * ND + nd) * s_max + s]

    cost = pl.CostEstimate(
        flops=int(nnz_tiles * tnd * tns * (5 * C_act + 2 * C_pad)),
        transcendentals=int(2 * nnz_tiles * tnd * tns),
        bytes_accessed=int(nnz_tiles * (tnd * tns * 2 + C_act * tns * 4 + tns * C_pad * 2)
                           + E * NP * (C_act * 4 + C_pad * 4)))

    return pl.pallas_call(
        kernel,
        out_shape=jax.ShapeDtypeStruct((E, NP, C_pad), jnp.float32),
        grid_spec=pltpu.PrefetchScalarGridSpec(
            num_scalar_prefetch=2,
            grid=(ND, E, s_max),
            in_specs=[
                pl.BlockSpec((None, tnd, tns),                                   # adj counts
                             lambda nd, e, s, ti, tc: (e, nd, src_tile(nd, e, s, ti, tc))),
                pl.BlockSpec((None, C_act, tns),                                 # xl^T (f32)
                             lambda nd, e, s, ti, tc: (e, 0, src_tile(nd, e, s, ti, tc))),
                pl.BlockSpec((None, tnd, C_act),                                 # xr narrow
                             lambda nd, e, s, ti, tc: (e, nd, 0)),
                pl.BlockSpec((None, tns, C_pad),                                 # xl (bf16)
                             lambda nd, e, s, ti, tc: (e, src_tile(nd, e, s, ti, tc), 0)),
                pl.BlockSpec(memory_space=pltpu.MemorySpace.SMEM),               # att scalars
                pl.BlockSpec((None, 1, C_pad), lambda nd, e, s, ti, tc: (e, 0, 0)),  # bias
            ],
            out_specs=pl.BlockSpec((None, tnd, C_pad), lambda nd, e, s, ti, tc: (e, nd, 0)),
            scratch_shapes=[
                pltpu.VMEM((tnd, 1), jnp.float32),       # running max m
                pltpu.VMEM((tnd, 1), jnp.float32),       # running denominator l
                pltpu.VMEM((tnd, C_pad), jnp.float32),   # running weighted-sum accumulator
            ],
        ),
        compiler_params=pltpu.CompilerParams(
            dimension_semantics=("parallel", "parallel", "arbitrary"),
            vmem_limit_bytes=VMEM_LIMIT_BYTES),
        cost_estimate=cost,
    )(tile_idx, tile_cnt, adj_all, xlt_all, xr_all, xl_all, att_all, bias_all)


# --------------------------------------------------------------------------------------
# Full forward: one HeteroConv({et: GATv2Conv(add_self_loops=False)}, aggr='mean') + ReLU.
# --------------------------------------------------------------------------------------
def hgnn_forward(x_dict, edge_index_dict, params, num_nodes, out_channels):
    edge_types = list(edge_index_dict.keys())
    node_types = list(x_dict.keys())
    E = len(edge_types)
    nt_index = {nt: i for i, nt in enumerate(node_types)}

    align = max(TILE_ND, TILE_NS, PROJ_TILE_N)
    NP = _round_up(max(num_nodes.values()), align)
    F_pad = _round_up(max(x.shape[1] for x in x_dict.values()), LANE)
    C = out_channels
    C_act = _round_up(C, SUBLANE)    # channels used in the logit phase (sublane-aligned)
    C_pad = _round_up(C, LANE)       # lane-dense channel count for MXU / output stores

    tnd = min(TILE_ND, NP)
    tns = min(TILE_NS, NP)
    tile_n = min(PROJ_TILE_N, NP)
    ND = NP // tnd
    NS = NP // tns

    # Dense per-edge-type edge-count masks + CSR-style per-(edge-type, dst-tile) lists of
    # nonzero source tiles (host-side preprocessing; multiplicity counts match PyG softmax
    # on duplicate edges).  Padded list entries repeat the last valid index so the pipeline
    # re-uses the already-resident block; the kernel skips them via pl.when anyway.
    adj_np = np.zeros((E, NP, NP), np.float32)
    for k, et in enumerate(edge_types):
        ei = np.asarray(edge_index_dict[et])
        np.add.at(adj_np[k], (ei[1], ei[0]), 1.0)
    blk_nonzero = adj_np.reshape(E, ND, tnd, NS, tns).any(axis=(2, 4))   # [E, ND, NS]
    tile_cnt_np = blk_nonzero.sum(-1).astype(np.int32)                   # [E, ND]
    s_max = int(max(1, tile_cnt_np.max()))
    tile_idx_np = np.zeros((E, ND, s_max), np.int32)
    for e in range(E):
        for nd in range(ND):
            nz = np.nonzero(blk_nonzero[e, nd])[0]
            if nz.size:
                tile_idx_np[e, nd, :nz.size] = nz
                tile_idx_np[e, nd, nz.size:] = nz[-1]
    adj_all = jnp.asarray(adj_np, jnp.bfloat16)                          # [E, NP, NP]
    tile_idx = jnp.asarray(tile_idx_np.reshape(-1))                      # [E*ND*s_max] (1-D SMEM)
    tile_cnt = jnp.asarray(tile_cnt_np.reshape(-1))                      # [E*ND]

    # One padded feature slab per node TYPE (no per-edge-type duplication); scalar-prefetch
    # map g -> node type drives the projection's x BlockSpec.
    x_types = jnp.stack([
        jnp.pad(x_dict[nt], ((0, NP - x_dict[nt].shape[0]), (0, F_pad - x_dict[nt].shape[1])))
        for nt in node_types]).astype(jnp.bfloat16)                      # [T, NP, F_pad]

    ws, bs, xmap = [], [], []
    for et in edge_types:
        src_t, _, dst_t = et
        p = params[et]
        for node_t, w_key, b_key in ((src_t, "w_l", "b_l"), (dst_t, "w_r", "b_r")):
            xmap.append(nt_index[node_t])
            w = p[w_key]
            ws.append(jnp.pad(w, ((0, F_pad - w.shape[0]), (0, C_pad - w.shape[1]))))
            bs.append(jnp.pad(p[b_key], ((0, 0), (0, C_pad - C))))
    w_all = jnp.stack(ws).astype(jnp.bfloat16)                           # [2E, F_pad, C_pad]
    b_all = jnp.stack(bs)                                                # [2E, 1, C_pad] f32
    xmap = jnp.asarray(xmap, jnp.int32)                                  # [2E]

    proj_bf16, proj_narrow = batched_linear(xmap, x_types, w_all, b_all, C_act, tile_n)
    xl_bf16 = proj_bf16[0::2]                            # lin_l(x_src)  [E, NP, C_pad] bf16
    xr_narrow = proj_narrow[1::2]                        # lin_r(x_dst)  [E, NP, C_act] f32
    xlt_all = jnp.transpose(proj_narrow[0::2], (0, 2, 1))   # [E, C_act, NP] f32 (tiny slab)

    att_all = jnp.concatenate(
        [jnp.pad(params[et]["att"], ((0, 0), (0, C_act - C))) for et in edge_types], axis=0)
    bias_all = jnp.stack(
        [jnp.pad(params[et]["bias"], ((0, 0), (0, C_pad - C))) for et in edge_types])

    out_all = gatv2_hetero_attention(
        tile_idx, tile_cnt, adj_all, xlt_all, xr_narrow, xl_bf16, att_all, bias_all,
        s_max=s_max, tnd=tnd, tns=tns, bf16_exp=_use_bf16_exp(),
        nnz_tiles=int(tile_cnt_np.sum()))                                # [E, NP, C_pad]

    # HeteroConv 'mean' across edge types per destination node type, then ReLU (JAX glue).
    sums, counts = {}, {}
    for k, et in enumerate(edge_types):
        dst_t = et[2]
        v = out_all[k, :num_nodes[dst_t], :C]
        sums[dst_t] = v if dst_t not in sums else sums[dst_t] + v
        counts[dst_t] = counts.get(dst_t, 0) + 1
    return {nt: jax.nn.relu(sums[nt] / counts[nt]) for nt in sums}


def _glorot(key, shape):
    limit = jnp.sqrt(6.0 / (shape[0] + shape[1]))
    return jax.random.uniform(key, shape, jnp.float32, -limit, limit)


if __name__ == "__main__":
    key = jax.random.PRNGKey(0)
    keys = iter(jax.random.split(key, 64))

    # Heterogeneous toy graph: two node types, three edge types.
    num_nodes = {"author": 12, "paper": 10}
    num_feats = {"author": 16, "paper": 24}
    out_channels = 8      # num_layers=1 -> the only layer uses out_channels
    num_edges = 20

    x_dict = {nt: jax.random.normal(next(keys), (num_nodes[nt], num_feats[nt]), jnp.float32)
              for nt in num_nodes}

    edge_types = [("author", "writes", "paper"),
                  ("paper", "rev_writes", "author"),
                  ("paper", "cites", "paper")]

    edge_index_dict = {}
    for et in edge_types:
        src_t, _, dst_t = et
        src = jax.random.randint(next(keys), (num_edges,), 0, num_nodes[src_t])
        dst = jax.random.randint(next(keys), (num_edges,), 0, num_nodes[dst_t])
        edge_index_dict[et] = jnp.stack([src, dst])   # [2, E], row0=src, row1=dst

    # Deterministic GATv2Conv parameters per edge type (heads=1).
    params = {}
    for et in edge_types:
        src_t, _, dst_t = et
        params[et] = {
            "w_l": _glorot(next(keys), (num_feats[src_t], out_channels)),
            "b_l": jnp.zeros((1, out_channels), jnp.float32),
            "w_r": _glorot(next(keys), (num_feats[dst_t], out_channels)),
            "b_r": jnp.zeros((1, out_channels), jnp.float32),
            "att": _glorot(next(keys), (1, out_channels)),
            "bias": jnp.zeros((1, out_channels), jnp.float32),
        }

    out_dict = hgnn_forward(x_dict, edge_index_dict, params, num_nodes, out_channels)
    for v in out_dict.values():
        jax.block_until_ready(v)

    # sanity: shapes [N_dst, out_channels], non-negative after ReLU, finite
    assert out_dict["paper"].shape == (num_nodes["paper"], out_channels)
    assert out_dict["author"].shape == (num_nodes["author"], out_channels)
    assert bool(jnp.all(out_dict["paper"] >= 0)) and bool(jnp.all(out_dict["author"] >= 0))
    assert bool(jnp.all(jnp.isfinite(out_dict["paper"]))) and bool(jnp.all(jnp.isfinite(out_dict["author"])))

    print("KERNEL_OK")
</pallas_src>

<mosaic_0001>
module attributes {stable_mosaic.version = 11 : i64} {
  func.func @_proj_kernel(%arg0: i32, %arg1: i32, %arg2: memref<6xi32, #tpu.memory_space<smem>>, %arg3: memref<1x256x128xbf16, #tpu.memory_space<vmem>>, %arg4: memref<1x128x128xbf16, #tpu.memory_space<vmem>>, %arg5: memref<1x1x128xf32, #tpu.memory_space<vmem>>, %arg6: memref<1x256x128xbf16, #tpu.memory_space<vmem>>, %arg7: memref<1x256x8xf32, #tpu.memory_space<vmem>>) attributes {dimension_semantics = [#tpu.dimension_semantics<parallel>, #tpu.dimension_semantics<parallel>], iteration_bounds = array<i64: 6, 1>, scalar_prefetch = 1 : i64, scratch_operands = 0 : i64, tpu.core_type = #tpu.core_type<tc>, window_params = [{transform_indices = @transform_0, window_bounds = array<i64: 1, 256, 128>}, {transform_indices = @transform_1, window_bounds = array<i64: 1, 128, 128>}, {transform_indices = @transform_2, window_bounds = array<i64: 1, 1, 128>}, {transform_indices = @transform_3, window_bounds = array<i64: 1, 256, 128>}, {transform_indices = @transform_4, window_bounds = array<i64: 1, 256, 8>}]} {
    %c0 = arith.constant 0 : index
    %c0_0 = arith.constant 0 : index
    %c0_1 = arith.constant 0 : index
    %0 = vector.load %arg3[%c0, %c0_0, %c0_1] : memref<1x256x128xbf16, #tpu.memory_space<vmem>>, vector<1x256x128xbf16>
    %1 = vector.shape_cast %0 : vector<1x256x128xbf16> to vector<256x128xbf16>
    %c0_2 = arith.constant 0 : index
    %c0_3 = arith.constant 0 : index
    %c0_4 = arith.constant 0 : index
    %2 = vector.load %arg4[%c0_2, %c0_3, %c0_4] : memref<1x128x128xbf16, #tpu.memory_space<vmem>>, vector<1x128x128xbf16>
    %3 = vector.shape_cast %2 : vector<1x128x128xbf16> to vector<128x128xbf16>
    %cst = arith.constant dense<0.000000e+00> : vector<256x128xf32>
    %4 = tpu.matmul %1, %3, %cst {dimension_numbers = #tpu.dot_dimension_numbers<[1], [0], [0], [1], [0, 0, 1, 1], [], []>} : vector<256x128xbf16>, vector<128x128xbf16>, vector<256x128xf32> -> vector<256x128xf32>
    %c0_5 = arith.constant 0 : index
    %c0_6 = arith.constant 0 : index
    %c0_7 = arith.constant 0 : index
    %5 = vector.load %arg5[%c0_5, %c0_6, %c0_7] : memref<1x1x128xf32, #tpu.memory_space<vmem>>, vector<1x1x128xf32>
    %6 = vector.shape_cast %5 : vector<1x1x128xf32> to vector<1x128xf32>
    %7 = vector.broadcast %6 : vector<1x128xf32> to vector<256x128xf32>
    %8 = arith.addf %4, %7 : vector<256x128xf32>
    %9 = arith.truncf %8 : vector<256x128xf32> to vector<256x128xbf16>
    %c0_8 = arith.constant 0 : index
    %c0_9 = arith.constant 0 : index
    %c0_10 = arith.constant 0 : index
    %10 = vector.load %arg6[%c0_8, %c0_9, %c0_10] : memref<1x256x128xbf16, #tpu.memory_space<vmem>>, vector<1x256x128xbf16>
    %11 = vector.shape_cast %10 : vector<1x256x128xbf16> to vector<256x128xbf16>
    %12 = vector.shape_cast %9 : vector<256x128xbf16> to vector<1x256x128xbf16>
    tpu.vector_store %arg6[%c0_8, %c0_9, %c0_10], %12 {strides = array<i32>} : memref<1x256x128xbf16, #tpu.memory_space<vmem>>, vector<1x256x128xbf16>,
    %13 = vector.extract_strided_slice %8 {offsets = [0, 0], sizes = [256, 8], strides = [1, 1]} : vector<256x128xf32> to vector<256x8xf32>
    %c0_11 = arith.constant 0 : index
    %c0_12 = arith.constant 0 : index
    %c0_13 = arith.constant 0 : index
    %14 = vector.load %arg7[%c0_11, %c0_12, %c0_13] : memref<1x256x8xf32, #tpu.memory_space<vmem>>, vector<1x256x8xf32>
    %15 = vector.shape_cast %14 : vector<1x256x8xf32> to vector<256x8xf32>
    %16 = vector.shape_cast %13 : vector<256x8xf32> to vector<1x256x8xf32>
    tpu.vector_store %arg7[%c0_11, %c0_12, %c0_13], %16 {strides = array<i32>} : memref<1x256x8xf32, #tpu.memory_space<vmem>>, vector<1x256x8xf32>,
    return
  }
  func.func @transform_0(%arg0: i32, %arg1: i32, %arg2: memref<6xi32, #tpu.memory_space<smem>>) -> (i32, i32, i32) {
    %0 = arith.index_cast %arg0 : i32 to index
    %1 = memref.load %arg2[%0] : memref<6xi32, #tpu.memory_space<smem>>
    %c0_i32 = arith.constant 0 : i32
    %c0_i32_0 = arith.constant 0 : i32
    return %1, %arg1, %c0_i32 : i32, i32, i32
  }
  func.func @transform_1(%arg0: i32, %arg1: i32, %arg2: memref<6xi32, #tpu.memory_space<smem>>) -> (i32, i32, i32) {
    %c0_i32 = arith.constant 0 : i32
    %c0_i32_0 = arith.constant 0 : i32
    %c0_i32_1 = arith.constant 0 : i32
    return %arg0, %c0_i32, %c0_i32_0 : i32, i32, i32
  }
  func.func @transform_2(%arg0: i32, %arg1: i32, %arg2: memref<6xi32, #tpu.memory_space<smem>>) -> (i32, i32, i32) {
    %c0_i32 = arith.constant 0 : i32
    %c0_i32_0 = arith.constant 0 : i32
    %c0_i32_1 = arith.constant 0 : i32
    return %arg0, %c0_i32, %c0_i32_0 : i32, i32, i32
  }
  func.func @transform_3(%arg0: i32, %arg1: i32, %arg2: memref<6xi32, #tpu.memory_space<smem>>) -> (i32, i32, i32) {
    %c0_i32 = arith.constant 0 : i32
    %c0_i32_0 = arith.constant 0 : i32
    return %arg0, %arg1, %c0_i32 : i32, i32, i32
  }
  func.func @transform_4(%arg0: i32, %arg1: i32, %arg2: memref<6xi32, #tpu.memory_space<smem>>) -> (i32, i32, i32) {
    %c0_i32 = arith.constant 0 : i32
    %c0_i32_0 = arith.constant 0 : i32
    return %arg0, %arg1, %c0_i32 : i32, i32, i32
  }
}

</mosaic_0001>

<bundles_post_ra>
// kernel: tpu_custom_call.1
= control target key start
LH: loop header
LB: loop body
LE: loop exit
PB: predicated region body
PF: predicated region fallthrough
CT: control target
= control target key end

     0   :  { %s2175_s0 = inlined_call_operand.hbm [shape: s32[6], index: 0, kind: input, shape index: {}]   ;;  %s2176_s1 = inlined_call_operand.hbm [shape: bf16[2,256,128], index: 1, kind: input, shape index: {}]   ;;  %s2177_s2 = inlined_call_operand.hbm [shape: bf16[6,128,128], index: 2, kind: input, shape index: {}]   ;;  %s2178_s3 = inlined_call_operand.vmem [shape: f32[6,1,128], index: 3, kind: input, shape index: {}]   ;;  %s2179_s4 = inlined_call_operand.hbm [shape: bf16[6,256,128], index: 4, kind: output, shape index: {0}]   ;;  %s2180_s5 = inlined_call_operand.vmem [shape: f32[6,256,8], index: 5, kind: output, shape index: {1}]  }
   0x1   :  { %s1483_s20 = scalar_lea.hbm %s2175_s0, 16 }
   0x2   :  { %p1484_p0 = scmp.ne.s32.totalorder %s2175_s0, %s1483_s20  ;;  %p1487_p1 = scmp.lt.u32.totalorder %s1483_s20, %s2175_s0 }
   0x4   :  { %p1489_p2 = pnand %p1487_p1, %p1484_p0 }
   0x6   :  { %1492 = shalt.err (!%p1489_p2)  }
   0x7   :  { %s1667_s25 = smov [#allocation3]  }
   0x8   :  { %12 = dma.hbm_to_smem %s2175_s0, 16, %s1667_s25, [#allocation2] }
   0x9   :  { %1617 = dma.done.wait [#allocation2], 16 }
   0xa   :  { %1618 = vsyncadd [#allocation2], 4294967280 }
   0xb   :  { %14 = sfence }
   0xc   :  { %15 = vsyncpa [#allocation5], 0 }
   0xd   :  { %17 = vsyncpa [#allocation5 + $0x1], 0 }
   0xe   :  { %18 = vsyncpa [#allocation8], 0 }
   0xf   :  { %20 = vsyncpa [#allocation8 + $0x1], 0 }
  0x10   :  { %21 = vsyncpa [#allocation6], 0 }
  0x11   :  { %23 = vsyncpa [#allocation6 + $0x1], 0  ;;  %s1717_s28 = smov 0   ;;  %s1719_s29 = smov 0  }
  0x12   :  { %s1721_s30 = smov 0   ;;  %s1723_s6 = smov 0  }
  0x13   :  { %s1725_s7 = smov 0   ;;  %s1727_s0 = smov 0  }
  0x14   :  { %s1729_s8 = smov 0   ;;  %s1731_s9 = smov 0  }
  0x15   :  { %s1733_s10 = smov 0  }
  0x16 LB: > { %s2181_s11 = sadd.s32 4294967295, %s1665_s10   ;;  %s41_s12 = sadd.s32 1, %s1661_s9  ;;  %s1665_s10 = sphi %s1733_s10, %s29_s10   ;;  %s1661_s9 = sphi %s1731_s9, %s2218_s9   ;;  %s1657_s8 = sphi %s1729_s8, %s2217_s8   ;;  %s1653_s0 = sphi %s1727_s0, %s2216_s0   ;;  %s1649_s7 = sphi %s1725_s7, %s2215_s7   ;;  %s1645_s6 = sphi %s1723_s6, %s2214_s6   ;;  %s1641_s30 = sphi %s1721_s30, %s2213_s30   ;;  %s1637_s29 = sphi %s1719_s29, %s2212_s29   ;;  %s1633_s28 = sphi %s1717_s28, %s2211_s28  }
  0x17   : > { %p43_p3 = scmp.ge.s32.totalorder %s41_s12, 6  ;;  %s45_s13 = sld [smem:[#allocation3 + %s1661_s9]] }
  0x18   : > { %s52_s14 = sadd.s32 1, %s1653_s0  ;;  %p59_p4 = scmp.ne.s32.totalorder %s1653_s0, %s1649_s7 }
  0x19   : > { %s2220_s12 = smov (%p43_p3, %s41_s12), 0  ;;  %p2183_p5 = scmp.eq.s32.totalorder %s1665_s10, 0 }
  0x1a   : > { %p65_p6 = scmp.ne.s32.totalorder %s1649_s7, %s1645_s6  ;;  %s46_s15 = sld [smem:[#allocation3 + %s2220_s12]] }
  0x1b   : > { %p1773_p7 = scmp.eq.s32.totalorder %s2181_s11, 0  ;;  %p1779_p8 = por %p2183_p5, %p59_p4 }
  0x1c   : > { %p2182_p10 = scmp.lt.s32.totalorder %s1665_s10, 6  ;;  %s197_s19 = sand.u32 1, %s1653_s0  }
  0x1d   : > { %s2189_s16 = scalar_select %p1773_p7, 1, 0 }
  0x1e   : > { %p1785_p9 = por %p1773_p7, %p65_p6  ;;  %s1066_s20 = sshll.u32 %s197_s19, 7 }
  0x1f   : > { %p1795_p11 = pnand %p2182_p10, %p1779_p8  ;;  %s201_s23 = scalar_lea.vmem [#allocation4], %s1066_s20 }
  0x20   : > { %s2191_s18 = scalar_select %p1785_p9, 1, 0 }
  0x21   : > { %s47_s22 = ssub.s32 %s45_s13, %s46_s15  ;;  %s211_s24 = sshll.u32 %s201_s23, 4  ;;  %s1799_s24 = int_to_ptr.vmem [resolvable:$true] %s211_s24 }
  0x22   : > { %p50_p12 = scmp.eq.s32.totalorder %s47_s22, 0  ;;  %p1072_p13 = scmp.ge.s32.totalorder %s1665_s10, 1 }
  0x23   : > { %s1359_s25 = scalar_select %p1779_p8, [#allocation3], [#allocation10] }
  0x24   : > { %s1804_s26 = scalar_select %p50_p12, %s1653_s0, %s52_s14  }
  0x25   : > { %s1360_s27 = scalar_select %p1779_p8, %s1661_s9, 0 }
  0x26   : > { %2193 = sst [smem:[#allocation16_spill]] %s1804_s26  ;;  %s2222_s25 = smov (!%p2182_p10, %s1359_s25), [#allocation11] }
  0x27   : > { %s2224_s27 = smov (!%p2182_p10, %s1360_s27), 0  ;;  %p246_p0 = scmp.lt.s32.totalorder %s1665_s10, 7 }
  0x28   : > { %s202_s6 = sld [smem:[%s2222_s25 + %s2224_s27]]  ;;  %s1063_s15 = sadd.s32 4294967294, %s1665_s10  }
  0x29   : > { %p1815_p1 = pnand %p1072_p13, %p246_p0  ;;  %s75_s20 = ssub.s32 %s1661_s9, %s2220_s12 }
  0x2a   : > { %p1822_p2 = scmp.eq.s32.totalorder %s75_s20, 0  ;;  %s78_s25 = sadd.s32 1, %s1641_s30 }
  0x2b   : > { %s2194_s13 = scalar_select %p1815_p1, 1, 0 }
  0x2c   : > { %s1832_s27 = scalar_lea.sflag [#allocation5], %s197_s19  ;;  %p1495_p4 = pneg %p1795_p11 }
  0x2e   : > { %s1140_s22 = sshll.u32 %s202_s6, 11 }
  0x2f   : > { %s1829_s11 = scalar_lea.hbm %s2176_s1, %s1140_s22  ;;  %s1498_s22 = scalar_lea.hbm %s2176_s1, 4096 }
  0x30   : > { %s1493_s26 = scalar_lea.hbm %s1829_s11, 2048  ;;  %p1499_p12 = scmp.lt.u32.totalorder %s1829_s11, %s2176_s1 }
  0x31   : > { %p1494_p3 = scmp.ne.s32.totalorder %s1829_s11, %s1493_s26  ;;  %p1500_p13 = scmp.lt.u32.totalorder %s1498_s22, %s1493_s26 }
  0x32   : > { %p1502_p10 = scmp.lt.u32.totalorder %s1493_s26, %s1829_s11 }
  0x33   : > { %p1496_p6 = pnand %p1495_p4, %p1494_p3  ;;  %p1501_p0 = por %p1500_p13, %p1499_p12 }
  0x35   : > { %p1497_p8 = pneg %p1496_p6  ;;  %p1503_p5 = por %p1502_p10, %p1501_p0 }
  0x37   : > { %p1504_p9 = pnand %p1503_p5, %p1497_p8 }
  0x39   : > { %1507 = shalt.err (!%p1504_p9)
}
  0x3a   : > { %s1508_s19 = scalar_lea.vmem %s1799_s24, 2048  ;;  %s1668_s6 = smov [#allocation4]  }
  0x3b   : > { %p1509_p3 = scmp.ne.s32.totalorder %s1799_s24, %s1508_s19  ;;  %s1513_s20 = sshll.u32 %s1668_s6, 4  ;;  %s1514_s20 = int_to_ptr.vmem [resolvable:$false] %s1513_s20 }
  0x3c   : > { %s1515_s17 = scalar_lea.vmem %s1514_s20, 4096  ;;  %p1516_p7 = scmp.lt.s32.totalorder %s1799_s24, %s1514_s20 }
  0x3d   : > { %p1511_p6 = pnand %p1509_p3, %p1495_p4  ;;  %p1517_p12 = scmp.lt.s32.totalorder %s1515_s17, %s1508_s19 }
  0x3f   : > { %p1512_p1 = pneg %p1511_p6  ;;  %p1518_p13 = por %p1517_p12, %p1516_p7 }
  0x41   : > { %p1519_p10 = pnand %p1518_p13, %p1512_p1 }
  0x43   : > { %1522 = shalt.err (!%p1519_p10)
}
  0x44   : > { %s2186_s26 = smov 64   ;;  %s2187_s22 = smov 4  }
  0x45   : > { %1372 = dma.hbm_to_vmem [thread:$0]  (!%p1795_p11), %s1829_s11, 2048, %s1799_s24, %s1832_s27, %s2186_s26, %s2186_s26, %s2187_s22  }
  0x46   : > { %s1868_s23 = scalar_select %p1822_p2, %s1641_s30, %s78_s25  }
  0x47   : > { %p85_p5 = scmp.ne.s32.totalorder %s1641_s30, %s1637_s29  ;;  %p91_p7 = scmp.ne.s32.totalorder %s1637_s29, %s1633_s28 }
  0x48   : > { %s2196_s19 = sadd.s32 4294967295, %s1665_s10   ;;  %p149_p1 = scmp.eq.s32.totalorder %s1063_s15, 5 }
  0x49   : > { %p143_p9 = scmp.eq.s32.totalorder %s2196_s19, 5  ;;  %p2197_p4 = scmp.eq.s32.totalorder %s1665_s10, 0 }
  0x4a   : > { %p2198_p0 = scmp.ne.s32.totalorder %s2189_s16, 0  ;;  %p1890_p11 = por %p149_p1, %p91_p7 }
  0x4b   : > { %p87_p8 = por %p85_p5, %p2197_p4  ;;  %p1886_p6 = por %p143_p9, %p85_p5 }
  0x4c   : > { %p1882_p3 = por %p91_p7, %p2198_p0  ;;  %s221_s14 = sand.u32 1, %s1641_s30  }
  0x4d   : > { %s2200_s11 = scalar_select %p1886_p6, 1, 0 }
  0x4e   : > { %s2201_s24 = scalar_select %p1890_p11, 1, 0 }
  0x4f   : > { %s1141_s25 = sshll.u32 %s1661_s9, 10  ;;  %s1069_s27 = sshll.u32 %s221_s14, 6 }
  0x50   : > { %s1899_s20 = scalar_lea.hbm %s2177_s2, %s1141_s25  ;;  %s225_s16 = scalar_lea.vmem [#allocation7], %s1069_s27 }
  0x51   : > { %s232_s17 = sshll.u32 %s225_s16, 4  ;;  %p2202_p2 = scmp.lt.s32.totalorder %s1665_s10, 6  ;;  %s1907_s17 = int_to_ptr.vmem [resolvable:$true] %s232_s17 }
  0x52   : > { %s1909_s26 = scalar_lea.sflag [#allocation8], %s221_s14  ;;  %s1523_s6 = scalar_lea.hbm %s1899_s20, 1024 }
  0x53   : > { %p1903_p12 = pnand %p2202_p2, %p87_p8  ;;  %p1524_p13 = scmp.ne.s32.totalorder %s1899_s20, %s1523_s6 }
  0x54   : > { %s1528_s15 = scalar_lea.hbm %s2177_s2, 6144  ;;  %p1529_p9 = scmp.lt.u32.totalorder %s1899_s20, %s2177_s2 }
  0x55   : > { %p1525_p10 = pneg %p1903_p12  ;;  %p1530_p1 = scmp.lt.u32.totalorder %s1528_s15, %s1523_s6 }
  0x56   : > { %p1532_p8 = scmp.lt.u32.totalorder %s1523_s6, %s1899_s20 }
  0x57   : > { %p1526_p5 = pnand %p1525_p10, %p1524_p13  ;;  %p1531_p4 = por %p1530_p1, %p1529_p9 }
  0x59   : > { %p1527_p7 = pneg %p1526_p5  ;;  %p1533_p0 = por %p1532_p8, %p1531_p4 }
  0x5b   : > { %p1534_p2 = pnand %p1533_p0, %p1527_p7 }
  0x5d   : > { %1537 = shalt.err (!%p1534_p2)
}
  0x5e   : > { %s1538_s14 = scalar_lea.vmem %s1907_s17, 1024  ;;  %s1671_s25 = smov [#allocation7]  }
  0x5f   : > { %p1539_p13 = scmp.ne.s32.totalorder %s1907_s17, %s1538_s14  ;;  %s1543_s27 = sshll.u32 %s1671_s25, 4  ;;  %s1544_s27 = int_to_ptr.vmem [resolvable:$false] %s1543_s27 }
  0x60   : > { %s1545_s22 = scalar_lea.vmem %s1544_s27, 2048  ;;  %p1546_p6 = scmp.lt.s32.totalorder %s1907_s17, %s1544_s27 }
  0x61   : > { %p1541_p5 = pnand %p1539_p13, %p1525_p10  ;;  %p1547_p9 = scmp.lt.s32.totalorder %s1545_s22, %s1538_s14 }
  0x63   : > { %p1542_p11 = pneg %p1541_p5  ;;  %p1548_p1 = por %p1547_p9, %p1546_p6 }
  0x65   : > { %p1549_p4 = pnand %p1548_p1, %p1542_p11 }
  0x67   : > { %1552 = shalt.err (!%p1549_p4)
}
  0x68   : > { %s2204_s6 = smov 4   ;;  %s2205_s15 = smov 64  }
  0x69   : > { %1375 = dma.hbm_to_vmem [thread:$0]  (!%p1903_p12), %s1899_s20, 1024, %s1907_s17, %s1909_s26, %s2205_s15, %s2205_s15, %s2204_s6  }
  0x6a   : > { %p2206_p10 = scmp.ne.s32.totalorder %s2194_s13, 0 }
  0x6b   : > { %s252_s16 = sand.u32 (!%p2206_p10), 1, %s1649_s7   ;;  %p2207_p6 = scmp.ne.s32.totalorder (!%p2206_p10), %s2191_s18, 0 }
  0x6c   : > { %250 = sbr.rel (%p2206_p10) target bundleno = 411 (0x19b), region = 32  ;;  %s1073_s25 = sshll.u32 (!%p2206_p10), %s252_s16, 7 }
  0x6d   : > { %s253_s14 = scalar_lea.sflag (!%p2206_p10), [#allocation5], %s252_s16  ;;  %s1943_s27 = scalar_lea.vmem (!%p2206_p10), [#allocation4], %s1073_s25 }
  0x73   : > { %1620 = dma.done.wait (%p2207_p6), %s253_s14, 2048  }
  0x74   : > { %1622 = vsyncadd (%p2207_p6), %s253_s14, 4294965248  ;;  %s1950_s19 = sand.u32 1, %s1637_s29  }
  0x75   : > { %s1074_s13 = sshll.u32 %s1950_s19, 6  ;;  %s262_s26 = scalar_lea.sflag [#allocation8], %s1950_s19 }
  0x76   : > { %s1954_s20 = scalar_lea.vmem [#allocation7], %s1074_s13 }
  0x77   : > { %1624 = dma.done.wait (%p1882_p3), %s262_s26, 1024  }
  0x78   : > { %1626 = vsyncadd (%p1882_p3), %s262_s26, 4294966272  ;;  %v1459_v0 = vld [vmem:[%s1954_s20] sm:$0xff]   ;;  %v1460_v1 = vld [vmem:[%s1954_s20 + $0x8] sm:$0xff]   ;;  %p309_p3 = scmp.lt.s32.totalorder %s1657_s8, 5  ;;  %vm844_vm0 = vcmask 64512   ;;  %s1075_s14 = sshll.u32 %s1950_s19, 7 }
  0x79   : > { %1295 = vmatprep.subr.bf16.mxu0 %v1459_v0  ;;  %1343 = vmatprep.subr.bf16.mxu1 %v1459_v0  ;;  %v1461_v2 = vld [vmem:[%s1954_s20 + $0x10] sm:$0xff]   ;;  %v1462_v3 = vld [vmem:[%s1954_s20 + $0x18] sm:$0xff]   ;;  %v1467_v4 = vld [vmem:[%s1943_s27] sm:$0xff]   ;;  %s1175_s13 = sshll.u32 %s1657_s8, 11  ;;  %s878_s21 = scalar_lea.sflag [#allocation6], %s1950_s19 }
  0x7a   : > { %1296 = vmatpush3.bf16.msra.mxu0 %v1459_v0  ;;  %1351 = vmatpush3.bf16.msra.mxu1 %v1459_v0  ;;  %v1468_v5 = vld [vmem:[%s1943_s27 + $0x40] sm:$0xff]   ;;  %v1464_v7 = vld [vmem:[%s1954_s20 + $0x28] sm:$0xff]   ;;  %v1465_v8 = vld [vmem:[%s1954_s20 + $0x30] sm:$0xff]   ;;  %s310_s18 = scalar_select %p309_p3, %s1657_s8, 5 }
  0x7b   : > { %1297 = vmatprep.subr.bf16.mxu0 %v1460_v1  ;;  %1344 = vmatprep.subr.bf16.mxu1 %v1460_v1  ;;  %v1463_v6 = vld [vmem:[%s1954_s20 + $0x20] sm:$0xff]   ;;  %v1466_v9 = vld [vmem:[%s1954_s20 + $0x38] sm:$0xff]   ;;  %v1469_v10 = vld [vmem:[%s1943_s27 + $0x8] sm:$0xff]   ;;  %p2208_p12 = scmp.ne.s32.totalorder %s2200_s11, 0 }
  0x7c   : > { %1311 = vmatprep.mubr.bf16.mxu0 %v1467_v4  ;;  %1327 = vmatprep.mubr.bf16.mxu1 %v1468_v5  ;;  %v1470_v11 = vld [vmem:[%s1943_s27 + $0x48] sm:$0xff]   ;;  %v1471_v12 = vld [vmem:[%s1943_s27 + $0x10] sm:$0xff]   ;;  %v1473_v14 = vld [vmem:[%s1943_s27 + $0x18] sm:$0xff]   ;;  %s311_s22 = scalar_lea.vmem %s2178_s3, %s310_s18  ;;  %s1142_s6 = sshll.u32 %s310_s18, 8 }
  0x7d   : > { %v1472_v13 = vld [vmem:[%s1943_s27 + $0x50] sm:$0xff]   ;;  %v1474_v15 = vld [vmem:[%s1943_s27 + $0x58] sm:$0xff]   ;;  %v1475_v16 = vld [vmem:[%s1943_s27 + $0x20] sm:$0xff]   ;;  %s1994_s25 = scalar_lea.vmem %s2180_s5, %s1142_s6  ;;  %s2108_s18 = scalar_lea.hbm %s2179_s4, %s1175_s13 }
  0x7e   : > { %1298 = vmatpush3.bf16.msra.mxu0 %v1460_v1  ;;  %1352 = vmatpush3.bf16.msra.mxu1 %v1460_v1  ;;  %v1476_v17 = vld [vmem:[%s1943_s27 + $0x60] sm:$0xff]   ;;  %v1477_v18 = vld [vmem:[%s1943_s27 + $0x28] sm:$0xff]   ;;  %v1479_v20 = vld [vmem:[%s1943_s27 + $0x30] sm:$0xff]  }
  0x7f   : > { %1299 = vmatprep.subr.bf16.mxu0 %v1461_v2  ;;  %1345 = vmatprep.subr.bf16.mxu1 %v1461_v2  ;;  %v1478_v19 = vld [vmem:[%s1943_s27 + $0x68] sm:$0xff]   ;;  %v1480_v21 = vld [vmem:[%s1943_s27 + $0x70] sm:$0xff]   ;;  %v1481_v22 = vld [vmem:[%s1943_s27 + $0x38] sm:$0xff]  }
  0x80   : > { %v1482_v23 = vld [vmem:[%s1943_s27 + $0x78] sm:$0xff]   ;;  %v1989_v24 = vld [vmem:[%s311_s22] ss:$0 sm:$0xff]  ;;  %s2021_s27 = scalar_lea.vmem [#allocation9], %s1075_s14  ;;  %s1672_s22 = smov [#allocation9]  }
  0x81   : > { %s902_s26 = sshll.u32 %s2021_s27, 4  ;;  %s1557_s6 = sshll.u32 %s1672_s22, 4  ;;  %s2110_s26 = int_to_ptr.vmem [resolvable:$true] %s902_s26  ;;  %s1558_s6 = int_to_ptr.vmem [resolvable:$false] %s1557_s6 }
  0x82   : > { %1300 = vmatpush3.bf16.msra.mxu0 %v1461_v2  ;;  %1353 = vmatpush3.bf16.msra.mxu1 %v1461_v2  ;;  %s1553_s17 = scalar_lea.vmem %s2110_s26, 2048  ;;  %s1559_s15 = scalar_lea.vmem %s1558_s6, 4096 }
  0x83   : > { %1301 = vmatprep.subr.bf16.mxu0 %v1462_v3  ;;  %1346 = vmatprep.subr.bf16.mxu1 %v1462_v3  ;;  %p1554_p11 = scmp.ne.s32.totalorder %s2110_s26, %s1553_s17  ;;  %p1560_p0 = scmp.lt.s32.totalorder %s2110_s26, %s1558_s6 }
  0x84   : > { %p1561_p2 = scmp.lt.s32.totalorder %s1559_s15, %s1553_s17 }
  0x85   : > { %p1555_p7 = pnand %p1554_p11, %p2208_p12 }
  0x86   : > { %1302 = vmatpush3.bf16.msra.mxu0 %v1462_v3  ;;  %1354 = vmatpush3.bf16.msra.mxu1 %v1462_v3  ;;  %p1562_p13 = por %p1561_p2, %p1560_p0 }
  0x87   : > { %1303 = vmatprep.subr.bf16.mxu0 %v1463_v6  ;;  %1347 = vmatprep.subr.bf16.mxu1 %v1463_v6  ;;  %p1556_p8 = pneg %p1555_p7 }
  0x89   : > { %p1563_p5 = pnand %p1562_p13, %p1556_p8 }
  0x8a   : > { %1304 = vmatpush3.bf16.msra.mxu0 %v1463_v6  ;;  %1355 = vmatpush3.bf16.msra.mxu1 %v1463_v6 }
  0x8b   : > { %1305 = vmatprep.subr.bf16.mxu0 %v1464_v7  ;;  %1348 = vmatprep.subr.bf16.mxu1 %v1464_v7 }
  0x8e   : > { %1306 = vmatpush3.bf16.msra.mxu0 %v1464_v7  ;;  %1356 = vmatpush3.bf16.msra.mxu1 %v1464_v7 }
  0x8f   : > { %1307 = vmatprep.subr.bf16.mxu0 %v1465_v8  ;;  %1349 = vmatprep.subr.bf16.mxu1 %v1465_v8 }
  0x92   : > { %1308 = vmatpush3.bf16.msra.mxu0 %v1465_v8  ;;  %1357 = vmatpush3.bf16.msra.mxu1 %v1465_v8 }
  0x93   : > { %1309 = vmatprep.subr.bf16.mxu0 %v1466_v9  ;;  %1350 = vmatprep.subr.bf16.mxu1 %v1466_v9 }
  0x96   : > { %1310 = vmatpush3.bf16.msra.mxu0 %v1466_v9  ;;  %1358 = vmatpush3.bf16.msra.mxu1 %v1466_v9 }
  0x99   : > { %1312 = vmatmul.mubr.bf16.vlgmr.msra.gmra.mrb[0].mxu0 %v1469_v10  ;;  %1328 = vmatmul.mubr.bf16.vlgmr.msra.gmra.mrb[0].mxu1 %v1470_v11 }
  0x9a   : > { %1315 = vmatprep.mubr.bf16.mxu0 %v1471_v12  ;;  %1331 = vmatprep.mubr.bf16.mxu1 %v1472_v13 }
  0xa1   : > { %1316 = vmatmul.mubr.bf16.gmra.mrb[4].mxu0 %v1473_v14  ;;  %1332 = vmatmul.mubr.bf16.gmra.mrb[4].mxu1 %v1474_v15 }
  0xa2   : > { %1319 = vmatprep.mubr.bf16.mxu0 %v1475_v16  ;;  %1335 = vmatprep.mubr.bf16.mxu1 %v1476_v17 }
  0xa9   : > { %1320 = vmatmul.mubr.bf16.gmra.mrb[8].mxu0 %v1477_v18  ;;  %1336 = vmatmul.mubr.bf16.gmra.mrb[8].mxu1 %v1478_v19 }
  0xaa   : > { %1323 = vmatprep.mubr.bf16.mxu0 %v1479_v20  ;;  %1339 = vmatprep.mubr.bf16.mxu1 %v1480_v21 }
  0xb1   : > { %1324 = vmatmul.mubr.bf16.gmra.mrb[12].mxu0 %v1481_v22  ;;  %1340 = vmatmul.mubr.bf16.gmra.mrb[12].mxu1 %v1482_v23 }
 0x16c   : > { %v1313_v25 = vpop.f32.mrb[0].mxu0  ;;  %v1329_v26 = vpop.f32.mrb[0].mxu1 }
 0x16d   : > { %v566_v27 = vadd.f32 %v1313_v25, %v1989_v24  ;;  %v630_v28 = vadd.f32 %v1329_v26, %v1989_v24  ;;  %v557_v29 = vpop.f32.mrb[1].mxu0  ;;  %v621_v30 = vpop.f32.mrb[1].mxu1 }
 0x16e   : > { %v558_v31 = vadd.f32 %v1989_v24, %v557_v29  ;;  %v622_v32 = vadd.f32 %v1989_v24, %v621_v30  ;;  %v1314_v33 = vpop.f32.mrb[2].mxu0  ;;  %v1330_v34 = vpop.f32.mrb[2].mxu1 }
 0x16f   : > { %847 = vst.msk [vmem:[%s1994_s25 + $0x10] sm:$0xff] %vm844_vm0, %v566_v27  ;;  %863 = vst.msk [vmem:[%s1994_s25 + $0x90] sm:$0xff] %vm844_vm0, %v630_v28  ;;  %v569_v35 = vadd.f32 %v1314_v33, %v1989_v24  ;;  %v633_v36 = vadd.f32 %v1330_v34, %v1989_v24  ;;  %v560_v37 = vpop.f32.mrb[3].mxu0  ;;  %v624_v38 = vpop.f32.mrb[3].mxu1 }
 0x170   : > { %845 = vst.msk [vmem:[%s1994_s25] sm:$0xff] %vm844_vm0, %v558_v31  ;;  %861 = vst.msk [vmem:[%s1994_s25 + $0x80] sm:$0xff] %vm844_vm0, %v622_v32  ;;  %v561_v39 = vadd.f32 %v1989_v24, %v560_v37  ;;  %v625_v40 = vadd.f32 %v1989_v24, %v624_v38 }
 0x171   : > { %v1184_v41 = vpack.c.bf16 %v569_v35, %v566_v27  ;;  %848 = vst.msk [vmem:[%s1994_s25 + $0x18] sm:$0xff] %vm844_vm0, %v569_v35  ;;  %v1224_v42 = vpack.c.bf16 %v633_v36, %v630_v28  ;;  %864 = vst.msk [vmem:[%s1994_s25 + $0x98] sm:$0xff] %vm844_vm0, %v633_v36 }
 0x172   : > { %v1179_v43 = vpack.c.bf16 %v561_v39, %v558_v31  ;;  %846 = vst.msk [vmem:[%s1994_s25 + $0x8] sm:$0xff] %vm844_vm0, %v561_v39  ;;  %v1219_v44 = vpack.c.bf16 %v625_v40, %v622_v32  ;;  %862 = vst.msk [vmem:[%s1994_s25 + $0x88] sm:$0xff] %vm844_vm0, %v625_v40 }
 0x173   : > { %1256 = vst [vmem:[%s2021_s27 + $0x8] sm:$0xff] %v1184_v41   ;;  %1264 = vst [vmem:[%s2021_s27 + $0x48] sm:$0xff] %v1224_v42  }
 0x174   : > { %1180 = vst [vmem:[%s2021_s27] sm:$0xff] %v1179_v43   ;;  %1263 = vst [vmem:[%s2021_s27 + $0x40] sm:$0xff] %v1219_v44   ;;  %v1317_v45 = vpop.f32.mrb[4].mxu0  ;;  %v1333_v46 = vpop.f32.mrb[4].mxu1 }
 0x175   : > { %v582_v47 = vadd.f32 %v1317_v45, %v1989_v24  ;;  %v646_v48 = vadd.f32 %v1333_v46, %v1989_v24  ;;  %v573_v49 = vpop.f32.mrb[5].mxu0  ;;  %v637_v50 = vpop.f32.mrb[5].mxu1 }
 0x176   : > { %v574_v51 = vadd.f32 %v1989_v24, %v573_v49  ;;  %v638_v52 = vadd.f32 %v1989_v24, %v637_v50  ;;  %v1318_v53 = vpop.f32.mrb[6].mxu0  ;;  %v1334_v54 = vpop.f32.mrb[6].mxu1 }
 0x177   : > { %851 = vst.msk [vmem:[%s1994_s25 + $0x30] sm:$0xff] %vm844_vm0, %v582_v47  ;;  %867 = vst.msk [vmem:[%s1994_s25 + $0xb0] sm:$0xff] %vm844_vm0, %v646_v48  ;;  %v585_v55 = vadd.f32 %v1318_v53, %v1989_v24  ;;  %v649_v56 = vadd.f32 %v1334_v54, %v1989_v24  ;;  %v576_v57 = vpop.f32.mrb[7].mxu0  ;;  %v640_v58 = vpop.f32.mrb[7].mxu1 }
 0x178   : > { %849 = vst.msk [vmem:[%s1994_s25 + $0x20] sm:$0xff] %vm844_vm0, %v574_v51  ;;  %865 = vst.msk [vmem:[%s1994_s25 + $0xa0] sm:$0xff] %vm844_vm0, %v638_v52  ;;  %v577_v59 = vadd.f32 %v1989_v24, %v576_v57  ;;  %v641_v60 = vadd.f32 %v1989_v24, %v640_v58 }
 0x179   : > { %v1194_v61 = vpack.c.bf16 %v585_v55, %v582_v47  ;;  %852 = vst.msk [vmem:[%s1994_s25 + $0x38] sm:$0xff] %vm844_vm0, %v585_v55  ;;  %v1234_v62 = vpack.c.bf16 %v649_v56, %v646_v48  ;;  %868 = vst.msk [vmem:[%s1994_s25 + $0xb8] sm:$0xff] %vm844_vm0, %v649_v56 }
 0x17a   : > { %v1189_v63 = vpack.c.bf16 %v577_v59, %v574_v51  ;;  %850 = vst.msk [vmem:[%s1994_s25 + $0x28] sm:$0xff] %vm844_vm0, %v577_v59  ;;  %v1229_v0 = vpack.c.bf16 %v641_v60, %v638_v52  ;;  %866 = vst.msk [vmem:[%s1994_s25 + $0xa8] sm:$0xff] %vm844_vm0, %v641_v60 }
 0x17b   : > { %1258 = vst [vmem:[%s2021_s27 + $0x18] sm:$0xff] %v1194_v61   ;;  %1266 = vst [vmem:[%s2021_s27 + $0x58] sm:$0xff] %v1234_v62  }
 0x17c   : > { %1257 = vst [vmem:[%s2021_s27 + $0x10] sm:$0xff] %v1189_v63   ;;  %1265 = vst [vmem:[%s2021_s27 + $0x50] sm:$0xff] %v1229_v0   ;;  %v1321_v1 = vpop.f32.mrb[8].mxu0  ;;  %v1337_v2 = vpop.f32.mrb[8].mxu1 }
 0x17d   : > { %v598_v3 = vadd.f32 %v1321_v1, %v1989_v24  ;;  %v662_v4 = vadd.f32 %v1337_v2, %v1989_v24  ;;  %v589_v5 = vpop.f32.mrb[9].mxu0  ;;  %v653_v6 = vpop.f32.mrb[9].mxu1 }
 0x17e   : > { %v590_v7 = vadd.f32 %v1989_v24, %v589_v5  ;;  %v654_v8 = vadd.f32 %v1989_v24, %v653_v6  ;;  %v1322_v9 = vpop.f32.mrb[10].mxu0  ;;  %v1338_v10 = vpop.f32.mrb[10].mxu1 }
 0x17f   : > { %855 = vst.msk [vmem:[%s1994_s25 + $0x50] sm:$0xff] %vm844_vm0, %v598_v3  ;;  %871 = vst.msk [vmem:[%s1994_s25 + $0xd0] sm:$0xff] %vm844_vm0, %v662_v4  ;;  %v601_v11 = vadd.f32 %v1322_v9, %v1989_v24  ;;  %v665_v12 = vadd.f32 %v1338_v10, %v1989_v24  ;;  %v592_v13 = vpop.f32.mrb[11].mxu0  ;;  %v656_v14 = vpop.f32.mrb[11].mxu1 }
 0x180   : > { %853 = vst.msk [vmem:[%s1994_s25 + $0x40] sm:$0xff] %vm844_vm0, %v590_v7  ;;  %869 = vst.msk [vmem:[%s1994_s25 + $0xc0] sm:$0xff] %vm844_vm0, %v654_v8  ;;  %v593_v15 = vadd.f32 %v1989_v24, %v592_v13  ;;  %v657_v16 = vadd.f32 %v1989_v24, %v656_v14 }
 0x181   : > { %v1204_v17 = vpack.c.bf16 %v601_v11, %v598_v3  ;;  %856 = vst.msk [vmem:[%s1994_s25 + $0x58] sm:$0xff] %vm844_vm0, %v601_v11  ;;  %v1244_v18 = vpack.c.bf16 %v665_v12, %v662_v4  ;;  %872 = vst.msk [vmem:[%s1994_s25 + $0xd8] sm:$0xff] %vm844_vm0, %v665_v12 }
 0x182   : > { %v1199_v19 = vpack.c.bf16 %v593_v15, %v590_v7  ;;  %854 = vst.msk [vmem:[%s1994_s25 + $0x48] sm:$0xff] %vm844_vm0, %v593_v15  ;;  %v1239_v20 = vpack.c.bf16 %v657_v16, %v654_v8  ;;  %870 = vst.msk [vmem:[%s1994_s25 + $0xc8] sm:$0xff] %vm844_vm0, %v657_v16 }
 0x183   : > { %1260 = vst [vmem:[%s2021_s27 + $0x28] sm:$0xff] %v1204_v17   ;;  %1268 = vst [vmem:[%s2021_s27 + $0x68] sm:$0xff] %v1244_v18  }
 0x184   : > { %1259 = vst [vmem:[%s2021_s27 + $0x20] sm:$0xff] %v1199_v19   ;;  %1267 = vst [vmem:[%s2021_s27 + $0x60] sm:$0xff] %v1239_v20   ;;  %v1325_v21 = vpop.f32.mrb[12].mxu0  ;;  %v1341_v22 = vpop.f32.mrb[12].mxu1 }
 0x185   : > { %v614_v23 = vadd.f32 %v1325_v21, %v1989_v24  ;;  %v678_v25 = vadd.f32 %v1341_v22, %v1989_v24  ;;  %v605_v26 = vpop.f32.mrb[13].mxu0  ;;  %v669_v27 = vpop.f32.mrb[13].mxu1 }
 0x186   : > { %v606_v28 = vadd.f32 %v1989_v24, %v605_v26  ;;  %v670_v29 = vadd.f32 %v1989_v24, %v669_v27  ;;  %v1326_v30 = vpop.f32.mrb[14].mxu0  ;;  %v1342_v31 = vpop.f32.mrb[14].mxu1 }
 0x187   : > { %859 = vst.msk [vmem:[%s1994_s25 + $0x70] sm:$0xff] %vm844_vm0, %v614_v23  ;;  %875 = vst.msk [vmem:[%s1994_s25 + $0xf0] sm:$0xff] %vm844_vm0, %v678_v25  ;;  %v617_v32 = vadd.f32 %v1326_v30, %v1989_v24  ;;  %v681_v33 = vadd.f32 %v1342_v31, %v1989_v24  ;;  %v608_v34 = vpop.f32.mrb[15].mxu0  ;;  %v672_v35 = vpop.f32.mrb[15].mxu1 }
 0x188   : > { %857 = vst.msk [vmem:[%s1994_s25 + $0x60] sm:$0xff] %vm844_vm0, %v606_v28  ;;  %873 = vst.msk [vmem:[%s1994_s25 + $0xe0] sm:$0xff] %vm844_vm0, %v670_v29  ;;  %v609_v36 = vadd.f32 %v1989_v24, %v608_v34  ;;  %v673_v37 = vadd.f32 %v1989_v24, %v672_v35 }
 0x189   : > { %v1214_v38 = vpack.c.bf16 %v617_v32, %v614_v23  ;;  %860 = vst.msk [vmem:[%s1994_s25 + $0x78] sm:$0xff] %vm844_vm0, %v617_v32  ;;  %v1254_v39 = vpack.c.bf16 %v681_v33, %v678_v25  ;;  %876 = vst.msk [vmem:[%s1994_s25 + $0xf8] sm:$0xff] %vm844_vm0, %v681_v33 }
 0x18a   : > { %v1209_v40 = vpack.c.bf16 %v609_v36, %v606_v28  ;;  %858 = vst.msk [vmem:[%s1994_s25 + $0x68] sm:$0xff] %vm844_vm0, %v609_v36  ;;  %v1249_v24 = vpack.c.bf16 %v673_v37, %v670_v29  ;;  %874 = vst.msk [vmem:[%s1994_s25 + $0xe8] sm:$0xff] %vm844_vm0, %v673_v37 }
 0x18b   : > { %1262 = vst [vmem:[%s2021_s27 + $0x38] sm:$0xff] %v1214_v38   ;;  %1270 = vst [vmem:[%s2021_s27 + $0x78] sm:$0xff] %v1254_v39  }
 0x18c   : > { %1261 = vst [vmem:[%s2021_s27 + $0x30] sm:$0xff] %v1209_v40   ;;  %1269 = vst [vmem:[%s2021_s27 + $0x70] sm:$0xff] %v1249_v24  }
 0x18d   : > { %1566 = shalt.err (!%p1563_p5)
}
 0x18e   : > { %s1567_s16 = scalar_lea.hbm %s2108_s18, 2048  ;;  %s1571_s27 = scalar_lea.hbm %s2179_s4, 12288 }
 0x18f   : > { %p1568_p9 = scmp.ne.s32.totalorder %s2108_s18, %s1567_s16  ;;  %p1572_p10 = scmp.lt.u32.totalorder %s2108_s18, %s2179_s4 }
 0x190   : > { %p1573_p6 = scmp.lt.u32.totalorder %s1571_s27, %s1567_s16  ;;  %p1575_p11 = scmp.lt.u32.totalorder %s1567_s16, %s2108_s18 }
 0x191   : > { %p1569_p1 = pnand %p1568_p9, %p2208_p12 }
 0x192   : > { %p1574_p3 = por %p1573_p6, %p1572_p10 }
 0x193   : > { %p1570_p4 = pneg %p1569_p1 }
 0x194   : > { %p1576_p7 = por %p1575_p11, %p1574_p3 }
 0x196   : > { %p1577_p8 = pnand %p1576_p7, %p1570_p4 }
 0x198   : > { %1580 = shalt.err (!%p1577_p8)
}
 0x199   : > { %s1673_s20 = smov 64   ;;  %s1674_s17 = smov 4  }
 0x19a   : > { %1365 = dma.vmem_to_hbm [thread:$0]  (%p2208_p12), %s2110_s26, 2048, %s2108_s18, %s878_s21, %s1673_s20, %s1673_s20, %s1674_s17  }
 0x19b PF: > { %p1381_p0 = scmp.ge.s32.totalorder %s1665_s10, 2  ;;  %s921_s22 = sand.u32 1, %s1633_s28  }
 0x19c   : > { %p2209_p2 = scmp.ne.s32.totalorder %s2201_s24, 0  ;;  %s922_s6 = scalar_lea.sflag [#allocation6], %s921_s22 }
 0x19e   : > { %p1377_p13 = pnand %p1381_p0, %p2209_p2 }
 0x1a0   : > { %1628 = dma.done.wait (!%p1377_p13), %s922_s6, 2048  }
 0x1a1   : > { %1630 = vsyncadd (!%p1377_p13), %s922_s6, 4294965248  ;;  %s29_s10 = sadd.s32 1, %s1665_s10   ;;  %s2210_s11 = sld [smem:[#allocation16_spill]] }
 0x1a2   : > { %p26_p5 = scmp.ge.s32.totalorder %s29_s10, 8   ;;  %s2211_s28 = smov %s1637_s29 }
 0x1a3   : > { %s2212_s29 = smov %s1641_s30  ;;  %s2213_s30 = smov %s1868_s23 }
 0x1a4   : > { %s2214_s6 = smov %s1649_s7  ;;  %s2215_s7 = smov %s1653_s0 }
 0x1a5   : > { %s2217_s8 = smov %s1661_s9  ;;  %s2218_s9 = smov %s2220_s12 }
 0x1a6   :  { %28 = sbr.rel (!%p26_p5) target bundleno = 22 (0x16), region = 105 }
 0x1a7   : > { %s2216_s0 = smov %s2210_s11 }
 0x1ad   :  { %939 = vsyncpa [#allocation5], 1 }
 0x1ae   :  { %941 = vsyncpa [#allocation5 + $0x1], 1 }
 0x1af   :  { %942 = vsyncpa [#allocation8], 1 }
 0x1b0   :  { %944 = vsyncpa [#allocation8 + $0x1], 1 }
 0x1b1   :  { %945 = vsyncpa [#allocation6], 1 }
 0x1b2   :  { %947 = vsyncpa [#allocation6 + $0x1], 1 }

</bundles_post_ra>
